<compile_context>
chip_gen: v6e
topology: v6e:2x2x1
jax: 0.10.0
libtpu: 0.0.40
codegen_flags: <defaults>
</compile_context>

<pallas_src>
import jax
import jax.numpy as jnp
from jax.experimental import pallas as pl
from jax.experimental.pallas import tpu as pltpu

_LANE = 128   # vreg lane width
_SUB = 8      # vreg sublane count


def _linear_softmax_kernel(x_ref, w_ref, b_ref, o_ref):
    # x_ref: (IN, 8, TB) f32 VMEM    w_ref: (OUT, IN) f32 SMEM
    # b_ref: (OUT,)      f32 SMEM    o_ref: (OUT, 8, TB) f32 VMEM
    out_f, in_f = w_ref.shape

    # Per-class logits on dense (8, TB) slabs: out_f*in_f scalar*vector FMAs (VPU).
    logits = []
    for c in range(out_f):
        acc = x_ref[0] * w_ref[c, 0]
        for k in range(1, in_f):
            acc = acc + x_ref[k] * w_ref[c, k]
        logits.append(acc + b_ref[c])

    # Numerically-stable softmax over the class axis, unrolled elementwise.
    m = logits[0]
    for r in logits[1:]:
        m = jnp.maximum(m, r)
    exps = [jnp.exp(r - m) for r in logits]
    denom = exps[0]
    for e in exps[1:]:
        denom = denom + e
    inv = jnp.float32(1.0) / denom   # exact; one divide per (8, TB) slab is negligible

    # Direct per-class stores (no concatenate temp).
    for c in range(out_f):
        o_ref[c] = (exps[c] * inv).astype(o_ref.dtype)


def multiclass_classification_forward(x, weight, bias, *, tb=8192):
    """x: (B, in_f) float; weight: (out_f, in_f) (PyTorch Linear layout); bias: (out_f,)."""
    B, in_f = x.shape
    out_f, in_f_w = weight.shape
    assert in_f == in_f_w and bias.shape == (out_f,)

    # Lane-aligned batch tile (TB lanes x 8 sublanes per grid step).
    TB = max(_LANE, (min(int(tb), 16384) // _LANE) * _LANE)
    # Prefer >= 4 pipelined grid steps when the batch is large enough.
    if B >= 4 * _SUB * _LANE:
        TB = min(TB, max(_LANE, (B // (4 * _SUB) // _LANE) * _LANE))
    chunk = _SUB * TB                      # batch elements per grid step
    ngrid = -(-B // chunk)
    if ngrid > 1 and ngrid % 2:
        ngrid += 1                         # even grid -> clean 2-TensorCore split on v7x
    B_pad = ngrid * chunk
    lanes = B_pad // _SUB                  # lane extent of the folded layout

    # Class-major + sublane-folded layout: (in_f, B_pad) -> (in_f, 8, B_pad/8).
    xT = x.astype(jnp.float32).T
    if B_pad != B:
        xT = jnp.pad(xT, ((0, 0), (0, B_pad - B)))
    x3 = xT.reshape(in_f, _SUB, lanes)

    out3 = pl.pallas_call(
        _linear_softmax_kernel,
        out_shape=jax.ShapeDtypeStruct((out_f, _SUB, lanes), jnp.float32),
        grid=(ngrid,),
        in_specs=[
            pl.BlockSpec((in_f, _SUB, TB), lambda i: (0, 0, i)),   # streamed x tiles
            pl.BlockSpec(memory_space=pltpu.MemorySpace.SMEM),     # weight (out_f,in_f)
            pl.BlockSpec(memory_space=pltpu.MemorySpace.SMEM),     # bias (out_f,)
        ],
        out_specs=pl.BlockSpec((out_f, _SUB, TB), lambda i: (0, 0, i)),
        compiler_params=pltpu.CompilerParams(
            dimension_semantics=("parallel",)),                    # megacore split
    )(x3, weight.astype(jnp.float32), bias.astype(jnp.float32))

    # Undo the fold, drop padded batch columns, return PyTorch layout (B, out_f).
    out_cm = out3.reshape(out_f, B_pad)
    return out_cm[:, :B].T


if __name__ == "__main__":
    key = jax.random.PRNGKey(0)
    k_x, k_w, k_b = jax.random.split(key, 3)

    B, IN_F, OUT_F = 2500, 4, 3   # exercises tiling (tb=128 -> 4 grid steps) + padding

    # torch.nn.Linear(4, 3)-style init: U(-1/sqrt(in), 1/sqrt(in)).
    bound = 1.0 / (IN_F ** 0.5)
    weight = jax.random.uniform(k_w, (OUT_F, IN_F), jnp.float32, -bound, bound)
    bias = jax.random.uniform(k_b, (OUT_F,), jnp.float32, -bound, bound)
    x = jax.random.normal(k_x, (B, IN_F), jnp.float32)

    # jit the whole wrapper so the layout plumbing around the kernel stays fused.
    fwd = jax.jit(lambda x, w, b: multiclass_classification_forward(x, w, b, tb=128))
    out = jax.block_until_ready(fwd(x, weight, bias))

    # Pure-JAX reference.
    ref = jax.nn.softmax(x @ weight.T + bias, axis=-1)
    assert out.shape == (B, OUT_F)
    assert jnp.allclose(out, ref, atol=1e-5), "mismatch vs reference"
    assert jnp.allclose(jnp.sum(out, axis=-1), 1.0, atol=1e-5)

    print("KERNEL_OK")
</pallas_src>

<mosaic_0001>
module attributes {stable_mosaic.version = 11 : i64} {
  func.func @_linear_softmax_kernel(%arg0: i32, %arg1: memref<4x8x128xf32, #tpu.memory_space<vmem>>, %arg2: memref<3x4xf32, #tpu.memory_space<smem>>, %arg3: memref<3xf32, #tpu.memory_space<smem>>, %arg4: memref<3x8x128xf32, #tpu.memory_space<vmem>>) attributes {dimension_semantics = [#tpu.dimension_semantics<parallel>], iteration_bounds = array<i64: 4>, scalar_prefetch = 0 : i64, scratch_operands = 0 : i64, tpu.core_type = #tpu.core_type<tc>, window_params = [{transform_indices = @transform_0, window_bounds = array<i64: 4, 8, 128>}, {transform_indices = @transform_1, window_bounds = array<i64: 3, 4>}, {transform_indices = @transform_2, window_bounds = array<i64: 3>}, {transform_indices = @transform_3, window_bounds = array<i64: 3, 8, 128>}]} {
    %c0 = arith.constant 0 : index
    %c0_0 = arith.constant 0 : index
    %c0_1 = arith.constant 0 : index
    %0 = vector.load %arg1[%c0, %c0_0, %c0_1] : memref<4x8x128xf32, #tpu.memory_space<vmem>>, vector<1x8x128xf32>
    %1 = vector.shape_cast %0 : vector<1x8x128xf32> to vector<8x128xf32>
    %c0_2 = arith.constant 0 : index
    %c0_3 = arith.constant 0 : index
    %2 = memref.load %arg2[%c0_2, %c0_3] : memref<3x4xf32, #tpu.memory_space<smem>>
    %3 = vector.broadcast %2 : f32 to vector<8x128xf32>
    %4 = arith.mulf %1, %3 : vector<8x128xf32>
    %c1 = arith.constant 1 : index
    %c0_4 = arith.constant 0 : index
    %c0_5 = arith.constant 0 : index
    %5 = vector.load %arg1[%c1, %c0_4, %c0_5] : memref<4x8x128xf32, #tpu.memory_space<vmem>>, vector<1x8x128xf32>
    %6 = vector.shape_cast %5 : vector<1x8x128xf32> to vector<8x128xf32>
    %c0_6 = arith.constant 0 : index
    %c1_7 = arith.constant 1 : index
    %7 = memref.load %arg2[%c0_6, %c1_7] : memref<3x4xf32, #tpu.memory_space<smem>>
    %8 = vector.broadcast %7 : f32 to vector<8x128xf32>
    %9 = arith.mulf %6, %8 : vector<8x128xf32>
    %10 = arith.addf %4, %9 : vector<8x128xf32>
    %c2 = arith.constant 2 : index
    %c0_8 = arith.constant 0 : index
    %c0_9 = arith.constant 0 : index
    %11 = vector.load %arg1[%c2, %c0_8, %c0_9] : memref<4x8x128xf32, #tpu.memory_space<vmem>>, vector<1x8x128xf32>
    %12 = vector.shape_cast %11 : vector<1x8x128xf32> to vector<8x128xf32>
    %c0_10 = arith.constant 0 : index
    %c2_11 = arith.constant 2 : index
    %13 = memref.load %arg2[%c0_10, %c2_11] : memref<3x4xf32, #tpu.memory_space<smem>>
    %14 = vector.broadcast %13 : f32 to vector<8x128xf32>
    %15 = arith.mulf %12, %14 : vector<8x128xf32>
    %16 = arith.addf %10, %15 : vector<8x128xf32>
    %c3 = arith.constant 3 : index
    %c0_12 = arith.constant 0 : index
    %c0_13 = arith.constant 0 : index
    %17 = vector.load %arg1[%c3, %c0_12, %c0_13] : memref<4x8x128xf32, #tpu.memory_space<vmem>>, vector<1x8x128xf32>
    %18 = vector.shape_cast %17 : vector<1x8x128xf32> to vector<8x128xf32>
    %c0_14 = arith.constant 0 : index
    %c3_15 = arith.constant 3 : index
    %19 = memref.load %arg2[%c0_14, %c3_15] : memref<3x4xf32, #tpu.memory_space<smem>>
    %20 = vector.broadcast %19 : f32 to vector<8x128xf32>
    %21 = arith.mulf %18, %20 : vector<8x128xf32>
    %22 = arith.addf %16, %21 : vector<8x128xf32>
    %c0_16 = arith.constant 0 : index
    %23 = memref.load %arg3[%c0_16] : memref<3xf32, #tpu.memory_space<smem>>
    %24 = vector.broadcast %23 : f32 to vector<8x128xf32>
    %25 = arith.addf %22, %24 : vector<8x128xf32>
    %c0_17 = arith.constant 0 : index
    %c0_18 = arith.constant 0 : index
    %c0_19 = arith.constant 0 : index
    %26 = vector.load %arg1[%c0_17, %c0_18, %c0_19] : memref<4x8x128xf32, #tpu.memory_space<vmem>>, vector<1x8x128xf32>
    %27 = vector.shape_cast %26 : vector<1x8x128xf32> to vector<8x128xf32>
    %c1_20 = arith.constant 1 : index
    %c0_21 = arith.constant 0 : index
    %28 = memref.load %arg2[%c1_20, %c0_21] : memref<3x4xf32, #tpu.memory_space<smem>>
    %29 = vector.broadcast %28 : f32 to vector<8x128xf32>
    %30 = arith.mulf %27, %29 : vector<8x128xf32>
    %c1_22 = arith.constant 1 : index
    %c0_23 = arith.constant 0 : index
    %c0_24 = arith.constant 0 : index
    %31 = vector.load %arg1[%c1_22, %c0_23, %c0_24] : memref<4x8x128xf32, #tpu.memory_space<vmem>>, vector<1x8x128xf32>
    %32 = vector.shape_cast %31 : vector<1x8x128xf32> to vector<8x128xf32>
    %c1_25 = arith.constant 1 : index
    %c1_26 = arith.constant 1 : index
    %33 = memref.load %arg2[%c1_25, %c1_26] : memref<3x4xf32, #tpu.memory_space<smem>>
    %34 = vector.broadcast %33 : f32 to vector<8x128xf32>
    %35 = arith.mulf %32, %34 : vector<8x128xf32>
    %36 = arith.addf %30, %35 : vector<8x128xf32>
    %c2_27 = arith.constant 2 : index
    %c0_28 = arith.constant 0 : index
    %c0_29 = arith.constant 0 : index
    %37 = vector.load %arg1[%c2_27, %c0_28, %c0_29] : memref<4x8x128xf32, #tpu.memory_space<vmem>>, vector<1x8x128xf32>
    %38 = vector.shape_cast %37 : vector<1x8x128xf32> to vector<8x128xf32>
    %c1_30 = arith.constant 1 : index
    %c2_31 = arith.constant 2 : index
    %39 = memref.load %arg2[%c1_30, %c2_31] : memref<3x4xf32, #tpu.memory_space<smem>>
    %40 = vector.broadcast %39 : f32 to vector<8x128xf32>
    %41 = arith.mulf %38, %40 : vector<8x128xf32>
    %42 = arith.addf %36, %41 : vector<8x128xf32>
    %c3_32 = arith.constant 3 : index
    %c0_33 = arith.constant 0 : index
    %c0_34 = arith.constant 0 : index
    %43 = vector.load %arg1[%c3_32, %c0_33, %c0_34] : memref<4x8x128xf32, #tpu.memory_space<vmem>>, vector<1x8x128xf32>
    %44 = vector.shape_cast %43 : vector<1x8x128xf32> to vector<8x128xf32>
    %c1_35 = arith.constant 1 : index
    %c3_36 = arith.constant 3 : index
    %45 = memref.load %arg2[%c1_35, %c3_36] : memref<3x4xf32, #tpu.memory_space<smem>>
    %46 = vector.broadcast %45 : f32 to vector<8x128xf32>
    %47 = arith.mulf %44, %46 : vector<8x128xf32>
    %48 = arith.addf %42, %47 : vector<8x128xf32>
    %c1_37 = arith.constant 1 : index
    %49 = memref.load %arg3[%c1_37] : memref<3xf32, #tpu.memory_space<smem>>
    %50 = vector.broadcast %49 : f32 to vector<8x128xf32>
    %51 = arith.addf %48, %50 : vector<8x128xf32>
    %c0_38 = arith.constant 0 : index
    %c0_39 = arith.constant 0 : index
    %c0_40 = arith.constant 0 : index
    %52 = vector.load %arg1[%c0_38, %c0_39, %c0_40] : memref<4x8x128xf32, #tpu.memory_space<vmem>>, vector<1x8x128xf32>
    %53 = vector.shape_cast %52 : vector<1x8x128xf32> to vector<8x128xf32>
    %c2_41 = arith.constant 2 : index
    %c0_42 = arith.constant 0 : index
    %54 = memref.load %arg2[%c2_41, %c0_42] : memref<3x4xf32, #tpu.memory_space<smem>>
    %55 = vector.broadcast %54 : f32 to vector<8x128xf32>
    %56 = arith.mulf %53, %55 : vector<8x128xf32>
    %c1_43 = arith.constant 1 : index
    %c0_44 = arith.constant 0 : index
    %c0_45 = arith.constant 0 : index
    %57 = vector.load %arg1[%c1_43, %c0_44, %c0_45] : memref<4x8x128xf32, #tpu.memory_space<vmem>>, vector<1x8x128xf32>
    %58 = vector.shape_cast %57 : vector<1x8x128xf32> to vector<8x128xf32>
    %c2_46 = arith.constant 2 : index
    %c1_47 = arith.constant 1 : index
    %59 = memref.load %arg2[%c2_46, %c1_47] : memref<3x4xf32, #tpu.memory_space<smem>>
    %60 = vector.broadcast %59 : f32 to vector<8x128xf32>
    %61 = arith.mulf %58, %60 : vector<8x128xf32>
    %62 = arith.addf %56, %61 : vector<8x128xf32>
    %c2_48 = arith.constant 2 : index
    %c0_49 = arith.constant 0 : index
    %c0_50 = arith.constant 0 : index
    %63 = vector.load %arg1[%c2_48, %c0_49, %c0_50] : memref<4x8x128xf32, #tpu.memory_space<vmem>>, vector<1x8x128xf32>
    %64 = vector.shape_cast %63 : vector<1x8x128xf32> to vector<8x128xf32>
    %c2_51 = arith.constant 2 : index
    %c2_52 = arith.constant 2 : index
    %65 = memref.load %arg2[%c2_51, %c2_52] : memref<3x4xf32, #tpu.memory_space<smem>>
    %66 = vector.broadcast %65 : f32 to vector<8x128xf32>
    %67 = arith.mulf %64, %66 : vector<8x128xf32>
    %68 = arith.addf %62, %67 : vector<8x128xf32>
    %c3_53 = arith.constant 3 : index
    %c0_54 = arith.constant 0 : index
    %c0_55 = arith.constant 0 : index
    %69 = vector.load %arg1[%c3_53, %c0_54, %c0_55] : memref<4x8x128xf32, #tpu.memory_space<vmem>>, vector<1x8x128xf32>
    %70 = vector.shape_cast %69 : vector<1x8x128xf32> to vector<8x128xf32>
    %c2_56 = arith.constant 2 : index
    %c3_57 = arith.constant 3 : index
    %71 = memref.load %arg2[%c2_56, %c3_57] : memref<3x4xf32, #tpu.memory_space<smem>>
    %72 = vector.broadcast %71 : f32 to vector<8x128xf32>
    %73 = arith.mulf %70, %72 : vector<8x128xf32>
    %74 = arith.addf %68, %73 : vector<8x128xf32>
    %c2_58 = arith.constant 2 : index
    %75 = memref.load %arg3[%c2_58] : memref<3xf32, #tpu.memory_space<smem>>
    %76 = vector.broadcast %75 : f32 to vector<8x128xf32>
    %77 = arith.addf %74, %76 : vector<8x128xf32>
    %78 = arith.maximumf %25, %51 : vector<8x128xf32>
    %79 = arith.maximumf %78, %77 : vector<8x128xf32>
    %80 = arith.subf %25, %79 : vector<8x128xf32>
    %81 = math.exp %80 : vector<8x128xf32>
    %82 = arith.subf %51, %79 : vector<8x128xf32>
    %83 = math.exp %82 : vector<8x128xf32>
    %84 = arith.subf %77, %79 : vector<8x128xf32>
    %85 = math.exp %84 : vector<8x128xf32>
    %86 = arith.addf %81, %83 : vector<8x128xf32>
    %87 = arith.addf %86, %85 : vector<8x128xf32>
    %cst = arith.constant 1.000000e+00 : f32
    %88 = vector.broadcast %cst : f32 to vector<8x128xf32>
    %89 = arith.divf %88, %87 : vector<8x128xf32>
    %90 = arith.mulf %81, %89 : vector<8x128xf32>
    %c0_59 = arith.constant 0 : index
    %c0_60 = arith.constant 0 : index
    %c0_61 = arith.constant 0 : index
    %91 = vector.load %arg4[%c0_59, %c0_60, %c0_61] : memref<3x8x128xf32, #tpu.memory_space<vmem>>, vector<1x8x128xf32>
    %92 = vector.shape_cast %91 : vector<1x8x128xf32> to vector<8x128xf32>
    %93 = vector.shape_cast %90 : vector<8x128xf32> to vector<1x8x128xf32>
    tpu.vector_store %arg4[%c0_59, %c0_60, %c0_61], %93 {strides = array<i32>} : memref<3x8x128xf32, #tpu.memory_space<vmem>>, vector<1x8x128xf32>,
    %94 = arith.mulf %83, %89 : vector<8x128xf32>
    %c1_62 = arith.constant 1 : index
    %c0_63 = arith.constant 0 : index
    %c0_64 = arith.constant 0 : index
    %95 = vector.load %arg4[%c1_62, %c0_63, %c0_64] : memref<3x8x128xf32, #tpu.memory_space<vmem>>, vector<1x8x128xf32>
    %96 = vector.shape_cast %95 : vector<1x8x128xf32> to vector<8x128xf32>
    %97 = vector.shape_cast %94 : vector<8x128xf32> to vector<1x8x128xf32>
    tpu.vector_store %arg4[%c1_62, %c0_63, %c0_64], %97 {strides = array<i32>} : memref<3x8x128xf32, #tpu.memory_space<vmem>>, vector<1x8x128xf32>,
    %98 = arith.mulf %85, %89 : vector<8x128xf32>
    %c2_65 = arith.constant 2 : index
    %c0_66 = arith.constant 0 : index
    %c0_67 = arith.constant 0 : index
    %99 = vector.load %arg4[%c2_65, %c0_66, %c0_67] : memref<3x8x128xf32, #tpu.memory_space<vmem>>, vector<1x8x128xf32>
    %100 = vector.shape_cast %99 : vector<1x8x128xf32> to vector<8x128xf32>
    %101 = vector.shape_cast %98 : vector<8x128xf32> to vector<1x8x128xf32>
    tpu.vector_store %arg4[%c2_65, %c0_66, %c0_67], %101 {strides = array<i32>} : memref<3x8x128xf32, #tpu.memory_space<vmem>>, vector<1x8x128xf32>,
    return
  }
  func.func @transform_0(%arg0: i32) -> (i32, i32, i32) {
    %c0_i32 = arith.constant 0 : i32
    %c0_i32_0 = arith.constant 0 : i32
    %c0_i32_1 = arith.constant 0 : i32
    return %c0_i32, %c0_i32_0, %arg0 : i32, i32, i32
  }
  func.func @transform_1(%arg0: i32) -> (i32, i32) {
    %c0_i32 = arith.constant 0 : i32
    %c0_i32_0 = arith.constant 0 : i32
    %c0_i32_1 = arith.constant 0 : i32
    return %c0_i32, %c0_i32_0 : i32, i32
  }
  func.func @transform_2(%arg0: i32) -> i32 {
    %c0_i32 = arith.constant 0 : i32
    %c0_i32_0 = arith.constant 0 : i32
    return %c0_i32 : i32
  }
  func.func @transform_3(%arg0: i32) -> (i32, i32, i32) {
    %c0_i32 = arith.constant 0 : i32
    %c0_i32_0 = arith.constant 0 : i32
    %c0_i32_1 = arith.constant 0 : i32
    return %c0_i32, %c0_i32_0, %arg0 : i32, i32, i32
  }
}

</mosaic_0001>

<bundles_post_ra>
// kernel: _lambda_.1
= control target key start
LH: loop header
LB: loop body
LE: loop exit
PB: predicated region body
PF: predicated region fallthrough
CT: control target
= control target key end

     0   :  { %8 = vsyncpa [#allocation4], 0  ;;  %s733_s0 = inlined_call_operand.vmem [shape: f32[4,8,512], index: 0, kind: input, shape index: {}]   ;;  %s734_s1 = inlined_call_operand.vmem [shape: f32[3,4], index: 1, kind: input, shape index: {}]   ;;  %s735_s2 = inlined_call_operand.vmem [shape: f32[3], index: 2, kind: input, shape index: {}]   ;;  %s736_s3 = inlined_call_operand.vmem [shape: f32[3,8,512], index: 3, kind: output, shape index: {}]  }
   0x1   :  { %9 = vsyncpa [#allocation6], 0  ;;  %s622_s12 = smov 0   ;;  %s624_s13 = smov 0  }
   0x2   :  { %s626_s14 = smov 0  }
   0x3 LB: > { %s638_s15 = sadd.s32 4294967295, %s598_s14   ;;  %s641_s16 = sadd.s32 1, %s598_s14   ;;  %s598_s14 = sphi %s626_s14, %s752_s14   ;;  %s594_s13 = sphi %s624_s13, %s751_s13   ;;  %s590_s12 = sphi %s622_s12, %s750_s12  }
   0x4   : > { %s19_s17 = ssub.s32 %s598_s14, %s641_s16  ;;  %s22_s18 = sadd.s32 1, %s594_s13 }
   0x5   : > { %p20_p0 = scmp.eq.s32.totalorder %s19_s17, 0  ;;  %p29_p1 = scmp.ne.s32.totalorder %s594_s13, %s590_s12 }
   0x6   : > { %p30_p2 = scmp.eq.s32.totalorder %s598_s14, 0  ;;  %p101_p3 = scmp.eq.s32.totalorder %s638_s15, 3 }
   0x7   : > { %s651_s19 = scalar_select %p20_p0, %s594_s13, %s22_s18  }
   0x8   : > { %p653_p4 = por %p30_p2, %p29_p1  ;;  %p657_p5 = por %p101_p3, %p29_p1 }
   0x9   : > { %p453_p6 = scmp.ge.s32.totalorder %s598_s14, 1  ;;  %p114_p7 = scmp.lt.s32.totalorder %s598_s14, 5 }
   0xa   : > { %s739_s20 = scalar_select %p653_p4, 1, 0 }
   0xb   : > { %s740_s21 = scalar_select %p657_p5, 1, 0 }
   0xc   : > { %p737_p8 = scmp.eq.s32.totalorder %s638_s15, 0  ;;  %p664_p9 = pnand %p453_p6, %p114_p7 }
   0xd   : > { %s127_s25 = sshll.u32 %s734_s1, 4  ;;  %s138_s28 = sshll.u32 %s735_s2, 4  ;;  %s128_s25 = int_to_ptr.vmem [resolvable:$true] %s127_s25  ;;  %s139_s28 = int_to_ptr.vmem [resolvable:$true] %s138_s28 }
   0xe   : > { %s741_s22 = scalar_select %p664_p9, 1, 0 }
   0xf   : > { %p493_p10 = pneg %p664_p9  ;;  %s538_s30 = scalar_lea.vmem %s128_s25, 64 }
  0x10   : > { %p539_p12 = scmp.ne.s32.totalorder %s128_s25, %s538_s30  ;;  %p546_p2 = scmp.lt.s32.totalorder %s128_s25, %s128_s25 }
  0x11   : > { %p678_p11 = pnand %p737_p8, %p493_p10  ;;  %p547_p3 = scmp.lt.s32.totalorder %s538_s30, %s538_s30 }
  0x13   : > { %p540_p13 = pneg %p678_p11  ;;  %p548_p6 = por %p547_p3, %p546_p2 }
  0x15   : > { %p541_p0 = pnand %p540_p13, %p539_p12 }
  0x17   : > { %p542_p1 = pneg %p541_p0 }
  0x19   : > { %p549_p7 = pnand %p548_p6, %p542_p1 }
  0x1b   : > { %552 = shalt.err (!%p549_p7)
}
  0x1c   : > { %s600_s4 = smov [#allocation3]   ;;  %s553_s5 = scalar_lea.vmem %s139_s28, 16 }
  0x1d   : > { %496 = dma.vmem_to_smem (!%p678_p11), %s128_s25, 64, %s600_s4, [#allocation4]  }
  0x1e   : > { %p554_p10 = scmp.ne.s32.totalorder %s139_s28, %s553_s5  ;;  %p561_p9 = scmp.lt.s32.totalorder %s139_s28, %s139_s28 }
  0x1f   : > { %p562_p4 = scmp.lt.s32.totalorder %s553_s5, %s553_s5 }
  0x20   : > { %p556_p8 = pnand %p554_p10, %p540_p13 }
  0x21   : > { %p563_p12 = por %p562_p4, %p561_p9 }
  0x22   : > { %p557_p5 = pneg %p556_p8 }
  0x24   : > { %p564_p0 = pnand %p563_p12, %p557_p5 }
  0x26   : > { %567 = shalt.err (!%p564_p0)
}
  0x27   : > { %s601_s6 = smov [#allocation5]   ;;  %p456_p1 = scmp.ge.s32.totalorder %s598_s14, 4 }
  0x28   : > { %499 = dma.vmem_to_smem (!%p678_p11), %s139_s28, 16, %s601_s6, [#allocation6]  }
  0x29   : > { %145 = sbr.rel (%p456_p1) target bundleno = 54 (0x36), region = 24  ;;  %p743_p2 = scmp.ne.s32.totalorder (!%p456_p1), %s739_s20, 0 }
  0x2e   : > { %148 = sbr.rel (!%p743_p2) target bundleno = 54 (0x36), region = 28  ;;  %s150_s7 = sand.u32 (%p743_p2), 1, %s594_s13  }
  0x2f   : > { %s458_s8 = sshll.u32 (%p743_p2), %s598_s14, 3  ;;  %s457_s9 = sshll.u32 (%p743_p2), %s150_s7, 5 }
  0x30   : > { %s154_s17 = scalar_lea.vmem (%p743_p2), %s733_s0, %s458_s8  ;;  %s152_s18 = scalar_lea.vmem (%p743_p2), [#allocation2], %s457_s9 }
  0x31   : > { %v189_v0 = vld [vmem:[%s154_s17] sm:$0xff] (%p743_p2) }
  0x32   : > { %v191_v1 = vld [vmem:[%s154_s17 + $0x20] sm:$0xff] (%p743_p2)  ;;  %190 = vst [vmem:[%s152_s18] sm:$0xff] (%p743_p2), %v189_v0 }
  0x33   : > { %v193_v2 = vld [vmem:[%s154_s17 + $0x40] sm:$0xff]  ;;  %192 = vst [vmem:[%s152_s18 + $0x8] sm:$0xff] %v191_v1 }
  0x34   : > { %194 = vst [vmem:[%s152_s18 + $0x10] sm:$0xff] %v193_v2  ;;  %v195_v3 = vld [vmem:[%s154_s17 + $0x60] sm:$0xff] }
  0x35   : > { %196 = vst [vmem:[%s152_s18 + $0x18] sm:$0xff] %v195_v3 }
  0x36 PF: > { %p744_p4 = scmp.ne.s32.totalorder %s741_s22, 0 }
  0x37   : > { %s208_s14 = sand.u32 (!%p744_p4), 1, %s590_s12   ;;  %p745_p5 = scmp.eq.s32.totalorder (!%p744_p4), %s638_s15, 0 }
  0x38   : > { %205 = sbr.rel (%p744_p4) target bundleno = 147 (0x93), region = 66  ;;  %s460_s20 = sshll.u32 (!%p744_p4), %s208_s14, 5 }
  0x39   : > { %s210_s23 = scalar_lea.vmem (!%p744_p4), [#allocation2], %s460_s20 }
  0x3d   : > { %581 = dma.done.wait (%p745_p5), [#allocation4], 64   ;;  %p746_p8 = pmov %p745_p5 }
  0x3e   : > { %p747_p9 = pmov %p745_p5 }
  0x3f   : > { %583 = vsyncadd (%p746_p8), [#allocation4], 4294967232 }
  0x40   : > { %585 = dma.done.wait (%p747_p9), [#allocation6], 16   ;;  %p748_p11 = pmov %p745_p5 }
  0x42   : > { %587 = vsyncadd (%p748_p11), [#allocation6], 4294967280 }
  0x43   : > { %222 = sfence }
  0x44   : > { %s240_s22 = sld [smem:[#allocation3]]  ;;  %v239_v4 = vld [vmem:[%s210_s23] sm:$0xff]  ;;  %v463_v5 = vld [vmem:[%s210_s23 + $0x8] sm:$0xff]  ;;  %v465_v7 = vld [vmem:[%s210_s23 + $0x10] sm:$0xff]  ;;  %s484_s11 = smul.u32 24, %s208_s14 }
  0x45   : > { %s464_s24 = sld [smem:[#allocation3 + $0x1]]  ;;  %v467_v13 = vld [vmem:[%s210_s23 + $0x18] sm:$0xff]  ;;  %p749_p13 = scmp.ne.s32.totalorder %s740_s21, 0 }
  0x46   : > { %s466_s25 = sld [smem:[#allocation3 + $0x2]]  ;;  %s238_s17 = scalar_lea.vmem [#allocation7], %s484_s11 }
  0x47   : > { %s468_s26 = sld [smem:[#allocation3 + $0x3]]  ;;  %s481_s18 = sshll.u32 (%p749_p13), %s638_s15, 3 }
  0x48   : > { %s709_s27 = sld [smem:[#allocation5]]  ;;  %s331_s12 = scalar_lea.vmem (%p749_p13), %s736_s3, %s481_s18 }
  0x49   : > { %s469_s28 = sld [smem:[#allocation3 + $0x80]] }
  0x4a   : > { %v241_v6 = vstv %s240_s22  ;;  %s470_s29 = sld [smem:[#allocation3 + $0x81]] }
  0x4b   : > { %v242_v8 = vmul.f32 %v241_v6, %v239_v4  ;;  %v246_v9 = vstv %s464_s24  ;;  %s471_s30 = sld [smem:[#allocation3 + $0x82]] }
  0x4c   : > { %v247_v10 = vmul.f32 %v463_v5, %v246_v9  ;;  %v252_v11 = vstv %s466_s25  ;;  %s472_s4 = sld [smem:[#allocation3 + $0x83]] }
  0x4d   : > { %v253_v12 = vmul.f32 %v465_v7, %v252_v11  ;;  %v258_v14 = vstv %s468_s26  ;;  %s711_s5 = sld [smem:[#allocation5 + $0x1]] }
  0x4e   : > { %v248_v15 = vadd.f32 %v247_v10, %v242_v8  ;;  %s474_s6 = sld [smem:[#allocation3 + $0x100]]  ;;  %v259_v18 = vmul.f32 %v467_v13, %v258_v14  ;;  %v262_v29 = vstv %s709_s27 }
  0x4f   : > { %v265_v16 = vstv %s469_s28  ;;  %s475_s7 = sld [smem:[#allocation3 + $0x101]] }
  0x50   : > { %v254_v17 = vadd.f32 %v253_v12, %v248_v15  ;;  %v266_v19 = vmul.f32 %v265_v16, %v239_v4  ;;  %v268_v20 = vstv %s470_s29  ;;  %s476_s8 = sld [smem:[#allocation3 + $0x102]] }
  0x51   : > { %v269_v21 = vmul.f32 %v463_v5, %v268_v20  ;;  %v272_v22 = vstv %s471_s30  ;;  %s477_s9 = sld [smem:[#allocation3 + $0x103]] }
  0x52   : > { %v273_v23 = vmul.f32 %v465_v7, %v272_v22  ;;  %v276_v24 = vstv %s472_s4  ;;  %s478_s10 = sld [smem:[#allocation5 + $0x2]]  ;;  %v260_v27 = vadd.f32 %v259_v18, %v254_v17 }
  0x53   : > { %v270_v25 = vadd.f32 %v269_v21, %v266_v19  ;;  %v277_v26 = vmul.f32 %v467_v13, %v276_v24  ;;  %v280_v33 = vstv %s711_s5 }
  0x54   : > { %v283_v28 = vstv %s474_s6  ;;  %v263_v39 = vadd.f32 %v262_v29, %v260_v27 }
  0x55   : > { %v274_v30 = vadd.f32 %v273_v23, %v270_v25  ;;  %v284_v31 = vmul.f32 %v283_v28, %v239_v4  ;;  %v286_v32 = vstv %s475_s7 }
  0x56   : > { %v287_v34 = vmul.f32 %v463_v5, %v286_v32  ;;  %v290_v35 = vstv %s476_s8 }
  0x57   : > { %v278_v36 = vadd.f32 %v277_v26, %v274_v30  ;;  %v291_v37 = vmul.f32 %v465_v7, %v290_v35  ;;  %v294_v38 = vstv %s477_s9 }
  0x58   : > { %v288_v40 = vadd.f32 %v287_v34, %v284_v31  ;;  %v295_v41 = vmul.f32 %v467_v13, %v294_v38  ;;  %v298_v44 = vstv %s478_s10 }
  0x59   : > { %v281_v42 = vadd.f32 %v280_v33, %v278_v36 }
  0x5a   : > { %v292_v43 = vadd.f32 %v291_v37, %v288_v40 }
  0x5b   : > { %v300_v46 = vmax.f32 %v263_v39, %v281_v42 }
  0x5c   : > { %v296_v45 = vadd.f32 %v295_v41, %v292_v43 }
  0x5e   : > { %v299_v47 = vadd.f32 %v298_v44, %v296_v45 }
  0x60   : > { %v301_v48 = vmax.f32 %v300_v46, %v299_v47 }
  0x62   : > { %v302_v49 = vsub.f32 %v263_v39, %v301_v48  ;;  %v305_v50 = vsub.f32 %v281_v42, %v301_v48  ;;  %v308_v51 = vsub.f32 %v299_v47, %v301_v48 }
  0x64   : > { %v303_v52 = vmul.f32 1.442695, %v302_v49  ;;  %v306_v53 = vmul.f32 1.442695, %v305_v50  ;;  %v309_v54 = vmul.f32 1.442695, %v308_v51 }
  0x66   : > { %530 = vpow2.f32 %v303_v52 }
  0x67   : > { %532 = vpow2.f32 %v306_v53 }
  0x68   : > { %534 = vpow2.f32 %v309_v54 }
  0x73   : > { %v531_v55 = vpop.eup %530 }
  0x74   : > { %v533_v56 = vpop.eup %532 }
  0x75   : > { %v535_v57 = vpop.eup %534  ;;  %v311_v58 = vadd.f32 %v533_v56, %v531_v55 }
  0x77   : > { %v312_v59 = vadd.f32 %v535_v57, %v311_v58 }
  0x79   : > { %536 = vrcp.f32 %v312_v59 }
  0x86   : > { %v537_v60 = vpop.eup %536  ;;  %329 = sbr.rel (!%p749_p13) target bundleno = 147 (0x93), region = 82 }
  0x87   : > { %v315_v61 = vmul.f32 %v537_v60, %v531_v55  ;;  %v317_v62 = vmul.f32 %v537_v60, %v533_v56  ;;  %v320_v63 = vmul.f32 %v537_v60, %v535_v57 }
  0x89   : > { %316 = vst [vmem:[%s238_s17] sm:$0xff] %v315_v61  ;;  %479 = vst [vmem:[%s238_s17 + $0x8] sm:$0xff] %v317_v62 }
  0x8a   : > { %480 = vst [vmem:[%s238_s17 + $0x10] sm:$0xff] %v320_v63 }
  0x90   : > { %v364_v0 = vld [vmem:[%s238_s17] sm:$0xff]  ;;  %v366_v1 = vld [vmem:[%s238_s17 + $0x8] sm:$0xff] }
  0x91   : > { %v368_v2 = vld [vmem:[%s238_s17 + $0x10] sm:$0xff]  ;;  %365 = vst [vmem:[%s331_s12] sm:$0xff] %v364_v0  ;;  %367 = vst [vmem:[%s331_s12 + $0x20] sm:$0xff] %v366_v1 }
  0x92   : > { %369 = vst [vmem:[%s331_s12 + $0x40] sm:$0xff] %v368_v2 }
  0x93 PF: > { %p12_p3 = scmp.ge.s32.totalorder %s641_s16, 6   ;;  %s750_s12 = smov %s594_s13 }
  0x94   : > { %s751_s13 = smov %s651_s19  ;;  %s752_s14 = smov %s641_s16 }
  0x95   :  { %14 = sbr.rel (!%p12_p3) target bundleno = 3 (0x3), region = 157 }
  0x9a   :  { %385 = vsyncpa [#allocation4], 1 }
  0x9b   :  { %387 = vsyncpa [#allocation4 + $0x1], 1 }
  0x9c   :  { %388 = vsyncpa [#allocation6], 1 }

</bundles_post_ra>
